<compile_context>
chip_gen: v6e
topology: v6e:2x2x1
jax: 0.10.0
libtpu: 0.0.40
codegen_flags: <defaults>
</compile_context>

<pallas_src>
import functools

import jax
import jax.numpy as jnp
from jax import lax
from jax.experimental import pallas as pl
from jax.experimental.pallas import tpu as pltpu


def _round_up(a, b):
    return ((a + b - 1) // b) * b


def _stru_decoder_kernel(z_ref, x_ref, o_ref, *, block_n, x_resident):
    """One (tm, tn) output tile: sigmoid(z_row @ x_col.T)."""
    if x_resident:
        # x is VMEM-resident (constant block index -> single DMA); slice the
        # (tn, D) column tile for this output column.
        j = pl.program_id(1)
        start = pl.multiple_of(j * block_n, block_n)
        x_tile = x_ref[pl.ds(start, block_n), :]
    else:
        x_tile = x_ref[...]
    # bf16 x bf16 -> f32 accumulation on the MXU; contract the shared latent
    # dim of both tiles directly (no in-kernel XLU transpose).
    logits = lax.dot_general(
        z_ref[...], x_tile,
        dimension_numbers=(((1,), (1,)), ((), ())),
        preferred_element_type=jnp.float32)
    # sigmoid(x) = 0.5 * tanh(x / 2) + 0.5 -> one EUP push per element.
    # Elementwise math stays f32 (v5e has no bf16 VPU/EUP); cast on the store.
    o_ref[...] = (0.5 * jnp.tanh(0.5 * logits) + 0.5).astype(o_ref.dtype)


def stru_decoder(z, *, dropout=0.5, rng_key=None, deterministic=False,
                 tm=256, tn=1024, out_dtype=jnp.bfloat16,
                 operand_dtype=jnp.bfloat16):
    """Pallas implementation of StruDecoder.forward.

    z             : (N, D) latent node representations.
    dropout       : dropout rate p applied to the RHS copy of z (F.dropout).
    rng_key       : JAX PRNG key for the dropout mask (required in training).
    deterministic : if True, skip dropout (eval mode).
    out_dtype     : dtype of the reconstructed adjacency (bf16 default; pass
                    jnp.float32 for exact-probability output, or an fp8 dtype
                    on v7x if the downstream loss tolerates it).
    """
    N, D = z.shape

    # ---- dropout hoisted out of the grid loop (PyTorch: x = F.dropout(z, p)) ----
    if deterministic or dropout <= 0.0:
        x = z
    else:
        if rng_key is None:
            raise ValueError(
                "rng_key must be provided when dropout > 0 and deterministic=False")
        keep = jax.random.bernoulli(rng_key, 1.0 - dropout, z.shape)
        x = jnp.where(keep, z * (1.0 / (1.0 - dropout)), jnp.zeros_like(z))

    # Narrow the MXU operands (halves input DMA; f32 accumulation in-kernel).
    z_op = z.astype(operand_dtype)
    x_op = x.astype(operand_dtype)

    # ---- tile selection: lane-dense (8, 128) multiples; >= 2 tiles per
    #      "parallel" axis when N permits so both v7x TensorCores get work ----
    tm = _round_up(min(tm, N), 8)
    tn = _round_up(min(tn, N), 128)
    if N >= 16:                                  # room for 2 row tiles (>=8 each)
        tm = min(tm, _round_up((N + 1) // 2, 8))
    if N >= 256:                                 # room for 2 col tiles (>=128 each)
        tn = min(tn, _round_up((N + 1) // 2, 128))

    # Pad rows (LHS) and columns (RHS) independently; crop the output at the end.
    Nr = _round_up(N, tm)
    Nc = _round_up(N, tn)
    if Nr > N:
        z_op = jnp.pad(z_op, ((0, Nr - N), (0, 0)))
    if Nc > N:
        x_op = jnp.pad(x_op, ((0, Nc - N), (0, 0)))

    in_bytes = jnp.dtype(operand_dtype).itemsize
    out_bytes = jnp.dtype(out_dtype).itemsize

    # Keep the dropped copy x fully VMEM-resident (single DMA) unless large.
    x_resident = Nc * D * in_bytes <= (8 << 20)
    if x_resident:
        x_spec = pl.BlockSpec((Nc, D), lambda i, j: (0, 0))
        x_buf_bytes = 2 * Nc * D * in_bytes
    else:
        x_spec = pl.BlockSpec((tn, D), lambda i, j: (j, 0))
        x_buf_bytes = 2 * tn * D * in_bytes

    vmem_need = (2 * tm * D * in_bytes          # LHS double buffer
                 + x_buf_bytes                  # RHS (resident or double-buffered)
                 + 2 * tm * tn * out_bytes)     # output double buffer
    # Explicit limit: comfortably above need, safely below v7x's 64 MiB physical.
    vmem_limit = int(min(48 << 20, max(16 << 20, 2 * vmem_need)))

    kernel = functools.partial(_stru_decoder_kernel,
                               block_n=tn, x_resident=x_resident)

    out = pl.pallas_call(
        kernel,
        out_shape=jax.ShapeDtypeStruct((Nr, Nc), out_dtype),
        grid=(Nr // tm, Nc // tn),
        in_specs=[
            pl.BlockSpec((tm, D), lambda i, j: (i, 0)),   # z row tile
            x_spec,                                        # x = dropout(z)
        ],
        out_specs=pl.BlockSpec((tm, tn), lambda i, j: (i, j)),
        compiler_params=pltpu.CompilerParams(
            dimension_semantics=("parallel", "parallel"),
            vmem_limit_bytes=vmem_limit),
        cost_estimate=pl.CostEstimate(
            flops=2 * Nr * Nc * D,
            transcendentals=Nr * Nc,
            bytes_accessed=Nr * Nc * out_bytes + (Nr + Nc) * D * in_bytes),
    )(z_op, x_op)

    if Nr > N or Nc > N:
        out = out[:N, :N]
    return out


if __name__ == "__main__":
    key = jax.random.PRNGKey(0)
    z_key, drop_key = jax.random.split(key)

    N, D = 256, 64                               # small: 256 nodes, latent 64
    z = jax.random.normal(z_key, (N, D), dtype=jnp.float32)

    # 1) Deterministic path (dropout off), f32 output — tight check against a
    #    reference built from the same bf16-quantized operands.
    out_f32 = stru_decoder(z, dropout=0.0, out_dtype=jnp.float32)
    zb = z.astype(jnp.bfloat16).astype(jnp.float32)
    ref_f32 = jax.nn.sigmoid(jnp.dot(zb, zb.T, precision=lax.Precision.HIGHEST))
    assert out_f32.shape == (N, N)
    assert jnp.allclose(out_f32, ref_f32, atol=2e-3), "mismatch (no dropout)"

    # 2) Training path: default p=0.5 like the module, bf16 output (default).
    out = stru_decoder(z, dropout=0.5, rng_key=drop_key)
    jax.block_until_ready(out)
    assert out.shape == (N, N) and out.dtype == jnp.bfloat16
    keep = jax.random.bernoulli(drop_key, 0.5, z.shape)
    x_drop = jnp.where(keep, z * 2.0, jnp.zeros_like(z))
    xb = x_drop.astype(jnp.bfloat16).astype(jnp.float32)
    ref = jax.nn.sigmoid(jnp.dot(zb, xb.T, precision=lax.Precision.HIGHEST))
    assert jnp.allclose(out.astype(jnp.float32), ref, atol=1e-2), \
        "mismatch (dropout path)"

    # 3) Ragged N (exercises the pad + crop path; not a tile multiple).
    N2 = 200
    z2 = jax.random.normal(z_key, (N2, D), dtype=jnp.float32)
    out2 = stru_decoder(z2, dropout=0.0, out_dtype=jnp.float32)
    z2b = z2.astype(jnp.bfloat16).astype(jnp.float32)
    ref2 = jax.nn.sigmoid(jnp.dot(z2b, z2b.T, precision=lax.Precision.HIGHEST))
    assert out2.shape == (N2, N2)
    assert jnp.allclose(out2, ref2, atol=2e-3), "mismatch (ragged N)"

    print("KERNEL_OK")
</pallas_src>

<mosaic_0001>
module attributes {stable_mosaic.version = 11 : i64} {
  func.func @_stru_decoder_kernel(%arg0: i32, %arg1: i32, %arg2: memref<128x64xbf16, #tpu.memory_space<vmem>>, %arg3: memref<256x64xbf16, #tpu.memory_space<vmem>>, %arg4: memref<128x128xf32, #tpu.memory_space<vmem>>) attributes {dimension_semantics = [#tpu.dimension_semantics<parallel>, #tpu.dimension_semantics<parallel>], iteration_bounds = array<i64: 2, 2>, scalar_prefetch = 0 : i64, scratch_operands = 0 : i64, tpu.core_type = #tpu.core_type<tc>, window_params = [{transform_indices = @transform_0, window_bounds = array<i64: 128, 64>}, {pipeline_mode = #tpu.pipeline_mode<synchronous>, transform_indices = @transform_1, window_bounds = array<i64: 256, 64>}, {transform_indices = @transform_2, window_bounds = array<i64: 128, 128>}]} {
    %c128_i32 = arith.constant 128 : i32
    %0 = arith.muli %arg1, %c128_i32 : i32
    %1 = tpu.assume_multiple %0, 128 : i32
    %2 = arith.index_cast %1 : i32 to index
    %c0 = arith.constant 0 : index
    %3 = vector.load %arg3[%2, %c0] : memref<256x64xbf16, #tpu.memory_space<vmem>>, vector<128x64xbf16>
    %c0_0 = arith.constant 0 : index
    %c0_1 = arith.constant 0 : index
    %4 = vector.load %arg2[%c0_0, %c0_1] : memref<128x64xbf16, #tpu.memory_space<vmem>>, vector<128x64xbf16>
    %cst = arith.constant dense<0.000000e+00> : vector<128x128xf32>
    %5 = tpu.matmul %4, %3, %cst {dimension_numbers = #tpu.dot_dimension_numbers<[1], [1], [0], [0], [0, 0, 1, 0], [], []>} : vector<128x64xbf16>, vector<128x64xbf16>, vector<128x128xf32> -> vector<128x128xf32>
    %cst_2 = arith.constant 5.000000e-01 : f32
    %6 = vector.broadcast %cst_2 : f32 to vector<128x128xf32>
    %7 = arith.mulf %6, %5 : vector<128x128xf32>
    %8 = math.tanh %7 : vector<128x128xf32>
    %cst_3 = arith.constant 5.000000e-01 : f32
    %9 = vector.broadcast %cst_3 : f32 to vector<128x128xf32>
    %10 = arith.mulf %9, %8 : vector<128x128xf32>
    %cst_4 = arith.constant 5.000000e-01 : f32
    %11 = vector.broadcast %cst_4 : f32 to vector<128x128xf32>
    %12 = arith.addf %10, %11 : vector<128x128xf32>
    %c0_5 = arith.constant 0 : index
    %c0_6 = arith.constant 0 : index
    %13 = vector.load %arg4[%c0_5, %c0_6] : memref<128x128xf32, #tpu.memory_space<vmem>>, vector<128x128xf32>
    tpu.vector_store %arg4[%c0_5, %c0_6], %12 {strides = array<i32>} : memref<128x128xf32, #tpu.memory_space<vmem>>, vector<128x128xf32>,
    return
  }
  func.func @transform_0(%arg0: i32, %arg1: i32) -> (i32, i32) {
    %c0_i32 = arith.constant 0 : i32
    %c0_i32_0 = arith.constant 0 : i32
    return %arg0, %c0_i32 : i32, i32
  }
  func.func @transform_1(%arg0: i32, %arg1: i32) -> (i32, i32) {
    %c0_i32 = arith.constant 0 : i32
    %c0_i32_0 = arith.constant 0 : i32
    %c0_i32_1 = arith.constant 0 : i32
    return %c0_i32, %c0_i32_0 : i32, i32
  }
  func.func @transform_2(%arg0: i32, %arg1: i32) -> (i32, i32) {
    %c0_i32 = arith.constant 0 : i32
    return %arg0, %arg1 : i32, i32
  }
}

</mosaic_0001>

<bundles_post_ra>
// kernel: tpu_custom_call.1
= control target key start
LH: loop header
LB: loop body
LE: loop exit
PB: predicated region body
PF: predicated region fallthrough
CT: control target
= control target key end

     0   :  { %7 = vsyncpa [#allocation3], 0  ;;  %s1167_s0 = inlined_call_operand.vmem [shape: bf16[256,64], index: 0, kind: input, shape index: {}]   ;;  %s1168_s1 = inlined_call_operand.vmem [shape: bf16[256,64], index: 1, kind: input, shape index: {}]   ;;  %s1169_s2 = inlined_call_operand.hbm [shape: f32[256,256], index: 2, kind: output, shape index: {}]  }
   0x1   :  { %9 = vsyncpa [#allocation3 + $0x1], 0  ;;  %s952_s9 = smov 0   ;;  %s954_s10 = smov 0  }
   0x2   :  { %s956_s11 = smov 0   ;;  %s958_s12 = smov 0  }
   0x3   :  { %s960_s13 = smov 0   ;;  %s962_s14 = smov 0  }
   0x4   :  { %s964_s15 = smov 0   ;;  %s966_s16 = smov 0  }
   0x5 LB: > { %s596_s17 = sadd.s32 4294967295, %s931_s16   ;;  %s597_s18 = sadd.s32 4294967294, %s931_s16   ;;  %s931_s16 = sphi %s966_s16, %s15_s16   ;;  %s927_s15 = sphi %s964_s15, %s1178_s15   ;;  %s923_s14 = sphi %s962_s14, %s1177_s14   ;;  %s919_s13 = sphi %s960_s13, %s1176_s13   ;;  %s915_s12 = sphi %s958_s12, %s1175_s12   ;;  %s911_s11 = sphi %s956_s11, %s1174_s11   ;;  %s907_s10 = sphi %s954_s10, %s1173_s10   ;;  %s903_s9 = sphi %s952_s9, %s1172_s9  }
   0x6   : > { %s24_s19 = sadd.s32 1, %s923_s14  ;;  %s27_s20 = sadd.s32 1, %s927_s15 }
   0x7   : > { %p25_p0 = scmp.ge.s32.totalorder %s24_s19, 2  ;;  %p93_p1 = scmp.ne.s32.totalorder %s911_s11, %s907_s10 }
   0x8   : > { %p94_p2 = scmp.eq.s32.totalorder %s596_s17, 3  ;;  %p99_p5 = scmp.ne.s32.totalorder %s907_s10, %s903_s9 }
   0x9   : > { %s1180_s19 = smov (%p25_p0, %s24_s19), 0  ;;  %s1182_s20 = smov (!%p25_p0, %s27_s20), %s927_s15 }
   0xa   : > { %s79_s21 = ssub.s32 %s923_s14, %s1180_s19  ;;  %p1003_p3 = por %p94_p2, %p93_p1 }
   0xb   : > { %p29_p4 = scmp.ge.s32.totalorder %s1182_s20, 2  ;;  %p100_p6 = scmp.eq.s32.totalorder %s597_s18, 3 }
   0xc   : > { %p600_p7 = scmp.ge.s32.totalorder %s931_s16, 1  ;;  %p130_p9 = scmp.lt.s32.totalorder %s931_s16, 5 }
   0xd   : > { %s1184_s20 = smov (%p29_p4, %s1182_s20), 0  ;;  %p1012_p8 = por %p100_p6, %p99_p5 }
   0xe   : > { %s78_s24 = ssub.s32 %s927_s15, %s1184_s20  ;;  %s83_s25 = sadd.s32 1, %s911_s11 }
   0xf   : > { %s80_s26 = sor.u32 %s79_s21, %s78_s24  ;;  %p131_p10 = pnand %p600_p7, %p130_p9 }
  0x10   : > { %p81_p11 = scmp.eq.s32.totalorder %s80_s26, 0  ;;  %s604_s28 = sshll.u32 (!%p131_p10), %s915_s12, 7 }
  0x11   : > { %134 = sbr.rel (%p131_p10) target bundleno = 330 (0x14a), region = 28  ;;  %s161_s29 = sshra.s32 (!%p131_p10), %s604_s28, 3 }
  0x12   : > { %s1021_s27 = scalar_select %p81_p11, %s911_s11, %s83_s25  }
  0x13   : > { %s602_s30 = sshll.u32 (!%p131_p10), %s919_s13, 4  ;;  %s605_s3 = sshll.u32 (!%p131_p10), %s161_s29, 2 }
  0x14   : > { %s1028_s6 = scalar_lea.vmem (!%p131_p10), %s1168_s1, %s605_s3  ;;  %p153_p12 = scmp.lt.s32.totalorder (!%p131_p10), %s602_s30, 31 }
  0x15   : > { %s149_s21 = sand.u32 (!%p131_p10), 1, %s907_s10   ;;  %s636_s26 = sshll.u32 (!%p131_p10), %s919_s13, 5 }
  0x16   : > { %vm277_vm0 = vcmask 523264   ;;  %v791_v0 = vld [vmem:[%s1028_s6 + $0x38] sm:$0xff]   ;;  %v792_v1 = vld [vmem:[%s1028_s6 + $0x30] sm:$0xff]   ;;  %s1186_s30 = smov (!%p153_p12, %s602_s30), 31  ;;  %v793_v4 = vld [vmem:[%s1028_s6 + $0x28] sm:$0xff]   ;;  %s601_s24 = sshll.u32 %s149_s21, 7 }
  0x17   : > { %701 = vmatprep.subr.msk.bf16.mxu0 %vm277_vm0, %v791_v0  ;;  %702 = vmatprep.subr.msk.bf16.mxu1 %vm277_vm0, %v791_v0  ;;  %v324_v2 = vsel %vm277_vm0, %v791_v0, 0  ;;  %v321_v3 = vsel %vm277_vm0, %v792_v1, 0  ;;  %s603_s7 = sshll.u32 %s1186_s30, 2  ;;  %v318_v7 = vsel %vm277_vm0, %v793_v4, 0  ;;  %v794_v8 = vld [vmem:[%s1028_s6 + $0x20] sm:$0xff]   ;;  %v795_v10 = vld [vmem:[%s1028_s6 + $0x18] sm:$0xff]   ;;  %s516_s28 = sadd.s32 %s915_s12, %s636_s26 }
  0x18   : > { %654 = vmatpush3.bf16.xpose.msra.mxu0 %v324_v2  ;;  %693 = vmatpush3.bf16.xpose.msra.mxu1 %v324_v2  ;;  %s1042_s18 = scalar_lea.vmem %s1167_s0, %s603_s7  ;;  %v315_v9 = vsel %vm277_vm0, %v794_v8, 0  ;;  %v312_v11 = vsel %vm277_vm0, %v795_v10, 0  ;;  %v796_v12 = vld [vmem:[%s1028_s6 + $0x10] sm:$0xff]   ;;  %v797_v14 = vld [vmem:[%s1028_s6 + $0x8] sm:$0xff]   ;;  %v798_v16 = vld [vmem:[%s1028_s6] sm:$0xff]   ;;  %s1086_s25 = scalar_lea.vmem [#allocation2], %s601_s24 }
  0x19   : > { %703 = vmatprep.subr.msk.bf16.mxu0 %vm277_vm0, %v792_v1  ;;  %704 = vmatprep.subr.msk.bf16.mxu1 %vm277_vm0, %v792_v1  ;;  %v799_v5 = vld [vmem:[%s1042_s18] sm:$0xff]   ;;  %v309_v13 = vsel %vm277_vm0, %v796_v12, 0  ;;  %v306_v15 = vsel %vm277_vm0, %v797_v14, 0  ;;  %v303_v17 = vsel %vm277_vm0, %v798_v16, 0  ;;  %v801_v18 = vld [vmem:[%s1042_s18 + $0x8] sm:$0xff]   ;;  %v803_v20 = vld [vmem:[%s1042_s18 + $0x10] sm:$0xff]  }
  0x1a   : > { %v800_v6 = vld [vmem:[%s1042_s18 + $0x20] sm:$0xff]   ;;  %669 = vmatprep.mubr.msk.bf16.mxu0 %vm277_vm0, %v799_v5  ;;  %v802_v19 = vld [vmem:[%s1042_s18 + $0x28] sm:$0xff]   ;;  %v804_v21 = vld [vmem:[%s1042_s18 + $0x30] sm:$0xff]   ;;  %s633_s13 = sshll.u32 %s516_s28, 7  ;;  %s519_s12 = sshll.u32 %s1086_s25, 4  ;;  %s1109_s12 = int_to_ptr.vmem [resolvable:$true] %s519_s12 }
  0x1b   : > { %677 = vmatprep.mubr.msk.bf16.mxu1 %vm277_vm0, %v800_v6  ;;  %v805_v22 = vld [vmem:[%s1042_s18 + $0x18] sm:$0xff]   ;;  %s1106_s3 = scalar_lea.hbm %s1169_s2, %s633_s13  ;;  %s1116_s4 = scalar_lea.sflag [#allocation3], %s149_s21 }
  0x1c   : > { %v806_v23 = vld [vmem:[%s1042_s18 + $0x38] sm:$0xff]   ;;  %s839_s5 = scalar_lea.vmem %s1109_s12, 2048  ;;  %s933_s6 = smov [#allocation2]  }
  0x1d   : > { %p840_p13 = scmp.ne.s32.totalorder %s1109_s12, %s839_s5  ;;  %s843_s7 = sshll.u32 %s933_s6, 4  ;;  %s844_s7 = int_to_ptr.vmem [resolvable:$false] %s843_s7 }
  0x1e   : > { %s845_s8 = scalar_lea.vmem %s844_s7, 4096  ;;  %p846_p2 = scmp.lt.s32.totalorder %s1109_s12, %s844_s7 }
  0x1f   : > { %p841_p0 = pnand %p840_p13, %p1003_p3  ;;  %p847_p4 = scmp.lt.s32.totalorder %s845_s8, %s839_s5 }
  0x20   : > { %656 = vmatpush3.bf16.xpose.msra.mxu0 %v321_v3  ;;  %694 = vmatpush3.bf16.xpose.msra.mxu1 %v321_v3 }
  0x21   : > { %705 = vmatprep.subr.msk.bf16.mxu0 %vm277_vm0, %v793_v4  ;;  %706 = vmatprep.subr.msk.bf16.mxu1 %vm277_vm0, %v793_v4  ;;  %p842_p1 = pneg %p841_p0  ;;  %p848_p5 = por %p847_p4, %p846_p2 }
  0x23   : > { %p849_p6 = pnand %p848_p5, %p842_p1 }
  0x28   : > { %658 = vmatpush3.bf16.xpose.msra.mxu0 %v318_v7  ;;  %695 = vmatpush3.bf16.xpose.msra.mxu1 %v318_v7 }
  0x29   : > { %707 = vmatprep.subr.msk.bf16.mxu0 %vm277_vm0, %v794_v8  ;;  %708 = vmatprep.subr.msk.bf16.mxu1 %vm277_vm0, %v794_v8 }
  0x30   : > { %660 = vmatpush3.bf16.xpose.msra.mxu0 %v315_v9  ;;  %696 = vmatpush3.bf16.xpose.msra.mxu1 %v315_v9 }
  0x31   : > { %709 = vmatprep.subr.msk.bf16.mxu0 %vm277_vm0, %v795_v10  ;;  %710 = vmatprep.subr.msk.bf16.mxu1 %vm277_vm0, %v795_v10 }
  0x38   : > { %662 = vmatpush3.bf16.xpose.msra.mxu0 %v312_v11  ;;  %697 = vmatpush3.bf16.xpose.msra.mxu1 %v312_v11 }
  0x39   : > { %711 = vmatprep.subr.msk.bf16.mxu0 %vm277_vm0, %v796_v12  ;;  %712 = vmatprep.subr.msk.bf16.mxu1 %vm277_vm0, %v796_v12 }
  0x40   : > { %664 = vmatpush3.bf16.xpose.msra.mxu0 %v309_v13  ;;  %698 = vmatpush3.bf16.xpose.msra.mxu1 %v309_v13 }
  0x41   : > { %713 = vmatprep.subr.msk.bf16.mxu0 %vm277_vm0, %v797_v14  ;;  %714 = vmatprep.subr.msk.bf16.mxu1 %vm277_vm0, %v797_v14 }
  0x48   : > { %666 = vmatpush3.bf16.xpose.msra.mxu0 %v306_v15  ;;  %699 = vmatpush3.bf16.xpose.msra.mxu1 %v306_v15 }
  0x49   : > { %715 = vmatprep.subr.msk.bf16.mxu0 %vm277_vm0, %v798_v16  ;;  %716 = vmatprep.subr.msk.bf16.mxu1 %vm277_vm0, %v798_v16 }
  0x50   : > { %668 = vmatpush3.bf16.xpose.msra.mxu0 %v303_v17  ;;  %700 = vmatpush3.bf16.xpose.msra.mxu1 %v303_v17 }
  0x57   : > { %670 = vmatmul.mubr.msk.bf16.vlgmr.msra.gmra.mxu0 %vm277_vm0, %v801_v18  ;;  %678 = vmatmul.mubr.msk.bf16.vlgmr.msra.gmra.mxu1 %vm277_vm0, %v802_v19 }
  0x58   : > { %673 = vmatprep.mubr.msk.bf16.mxu0 %vm277_vm0, %v803_v20  ;;  %681 = vmatprep.mubr.msk.bf16.mxu1 %vm277_vm0, %v804_v21 }
  0x5f   : > { %674 = vmatmul.mubr.msk.bf16.gmra.mxu0 %vm277_vm0, %v805_v22  ;;  %682 = vmatmul.mubr.msk.bf16.gmra.mxu1 %vm277_vm0, %v806_v23 }
 0x117   : > { %v671_v24 = vpop.f32.mrf.mxu0  ;;  %v679_v25 = vpop.f32.mrf.mxu1 }
 0x118   : > { %v425_v26 = vmul.f32 0.5, %v671_v24  ;;  %v433_v27 = vmul.f32 0.5, %v679_v25 }
 0x119   : > { %v360_v28 = vpop.f32.mrf.mxu0  ;;  %v392_v29 = vpop.f32.mrf.mxu1 }
 0x11a   : > { %807 = vtanh.f32 %v425_v26  ;;  %v423_v30 = vmul.f32 0.5, %v360_v28  ;;  %v431_v31 = vmul.f32 0.5, %v392_v29 }
 0x11b   : > { %809 = vtanh.f32 %v433_v27  ;;  %v672_v32 = vpop.f32.mrf.mxu0  ;;  %v680_v33 = vpop.f32.mrf.mxu1 }
 0x11c   : > { %811 = vtanh.f32 %v423_v30  ;;  %v426_v34 = vmul.f32 0.5, %v672_v32  ;;  %v434_v35 = vmul.f32 0.5, %v680_v33 }
 0x11d   : > { %813 = vtanh.f32 %v431_v31  ;;  %v363_v36 = vpop.f32.mrf.mxu0  ;;  %v395_v37 = vpop.f32.mrf.mxu1 }
 0x11e   : > { %815 = vtanh.f32 %v426_v34  ;;  %v424_v38 = vmul.f32 0.5, %v363_v36  ;;  %v432_v39 = vmul.f32 0.5, %v395_v37 }
 0x11f   : > { %817 = vtanh.f32 %v434_v35  ;;  %v675_v40 = vpop.f32.mrf.mxu0  ;;  %v683_v41 = vpop.f32.mrf.mxu1 }
 0x120   : > { %819 = vtanh.f32 %v424_v38  ;;  %v429_v42 = vmul.f32 0.5, %v675_v40  ;;  %v437_v43 = vmul.f32 0.5, %v683_v41 }
 0x121   : > { %821 = vtanh.f32 %v432_v39  ;;  %v376_v44 = vpop.f32.mrf.mxu0  ;;  %v408_v45 = vpop.f32.mrf.mxu1 }
 0x122   : > { %823 = vtanh.f32 %v429_v42  ;;  %v427_v46 = vmul.f32 0.5, %v376_v44  ;;  %v435_v47 = vmul.f32 0.5, %v408_v45 }
 0x123   : > { %825 = vtanh.f32 %v437_v43  ;;  %v676_v48 = vpop.f32.mrf.mxu0  ;;  %v684_v49 = vpop.f32.mrf.mxu1 }
 0x124   : > { %827 = vtanh.f32 %v427_v46  ;;  %v430_v50 = vmul.f32 0.5, %v676_v48  ;;  %v438_v51 = vmul.f32 0.5, %v684_v49 }
 0x125   : > { %829 = vtanh.f32 %v435_v47  ;;  %v379_v52 = vpop.f32.mrf.mxu0  ;;  %v411_v53 = vpop.f32.mrf.mxu1 }
 0x126   : > { %831 = vtanh.f32 %v430_v50  ;;  %v428_v54 = vmul.f32 0.5, %v379_v52  ;;  %v436_v55 = vmul.f32 0.5, %v411_v53 }
 0x127   : > { %v808_v56 = vpop.eup %807  ;;  %833 = vtanh.f32 %v438_v51 }
 0x128   : > { %v810_v57 = vpop.eup %809  ;;  %v457_v58 = vmul.f32 0.5, %v808_v56  ;;  %835 = vtanh.f32 %v428_v54 }
 0x129   : > { %v812_v59 = vpop.eup %811  ;;  %v465_v60 = vmul.f32 0.5, %v810_v57  ;;  %837 = vtanh.f32 %v436_v55 }
 0x12a   : > { %v814_v61 = vpop.eup %813  ;;  %v473_v62 = vadd.f32 0.5, %v457_v58  ;;  %v455_v63 = vmul.f32 0.5, %v812_v59 }
 0x12b   : > { %v816_v0 = vpop.eup %815  ;;  %v481_v1 = vadd.f32 0.5, %v465_v60  ;;  %v463_v2 = vmul.f32 0.5, %v814_v61 }
 0x12c   : > { %v818_v3 = vpop.eup %817  ;;  %489 = vst [vmem:[%s1086_s25 + $0x10] sm:$0xff] %v473_v62  ;;  %v471_v4 = vadd.f32 0.5, %v455_v63  ;;  %v458_v5 = vmul.f32 0.5, %v816_v0 }
 0x12d   : > { %v820_v6 = vpop.eup %819  ;;  %497 = vst [vmem:[%s1086_s25 + $0x50] sm:$0xff] %v481_v1  ;;  %v479_v7 = vadd.f32 0.5, %v463_v2  ;;  %v466_v8 = vmul.f32 0.5, %v818_v3 }
 0x12e   : > { %v822_v9 = vpop.eup %821  ;;  %487 = vst [vmem:[%s1086_s25] sm:$0xff] %v471_v4  ;;  %v474_v10 = vadd.f32 0.5, %v458_v5  ;;  %v456_v11 = vmul.f32 0.5, %v820_v6 }
 0x12f   : > { %v824_v12 = vpop.eup %823  ;;  %495 = vst [vmem:[%s1086_s25 + $0x40] sm:$0xff] %v479_v7  ;;  %v482_v13 = vadd.f32 0.5, %v466_v8  ;;  %v464_v14 = vmul.f32 0.5, %v822_v9 }
 0x130   : > { %v826_v15 = vpop.eup %825  ;;  %490 = vst [vmem:[%s1086_s25 + $0x18] sm:$0xff] %v474_v10  ;;  %v472_v16 = vadd.f32 0.5, %v456_v11  ;;  %v461_v17 = vmul.f32 0.5, %v824_v12 }
 0x131   : > { %v828_v18 = vpop.eup %827  ;;  %498 = vst [vmem:[%s1086_s25 + $0x58] sm:$0xff] %v482_v13  ;;  %v480_v19 = vadd.f32 0.5, %v464_v14  ;;  %v469_v20 = vmul.f32 0.5, %v826_v15 }
 0x132   : > { %v830_v21 = vpop.eup %829  ;;  %488 = vst [vmem:[%s1086_s25 + $0x8] sm:$0xff] %v472_v16  ;;  %v477_v22 = vadd.f32 0.5, %v461_v17  ;;  %v459_v23 = vmul.f32 0.5, %v828_v18 }
 0x133   : > { %v832_v24 = vpop.eup %831  ;;  %496 = vst [vmem:[%s1086_s25 + $0x48] sm:$0xff] %v480_v19  ;;  %v485_v25 = vadd.f32 0.5, %v469_v20  ;;  %v467_v26 = vmul.f32 0.5, %v830_v21 }
 0x134   : > { %v834_v27 = vpop.eup %833  ;;  %493 = vst [vmem:[%s1086_s25 + $0x30] sm:$0xff] %v477_v22  ;;  %v475_v28 = vadd.f32 0.5, %v459_v23  ;;  %v462_v29 = vmul.f32 0.5, %v832_v24 }
 0x135   : > { %v836_v30 = vpop.eup %835  ;;  %501 = vst [vmem:[%s1086_s25 + $0x70] sm:$0xff] %v485_v25  ;;  %v483_v31 = vadd.f32 0.5, %v467_v26  ;;  %v470_v32 = vmul.f32 0.5, %v834_v27 }
 0x136   : > { %v838_v33 = vpop.eup %837  ;;  %491 = vst [vmem:[%s1086_s25 + $0x20] sm:$0xff] %v475_v28  ;;  %v478_v34 = vadd.f32 0.5, %v462_v29  ;;  %v460_v35 = vmul.f32 0.5, %v836_v30 }
 0x137   : > { %499 = vst [vmem:[%s1086_s25 + $0x60] sm:$0xff] %v483_v31  ;;  %v486_v36 = vadd.f32 0.5, %v470_v32  ;;  %v468_v37 = vmul.f32 0.5, %v838_v33 }
 0x138   : > { %494 = vst [vmem:[%s1086_s25 + $0x38] sm:$0xff] %v478_v34  ;;  %v476_v38 = vadd.f32 0.5, %v460_v35 }
 0x139   : > { %502 = vst [vmem:[%s1086_s25 + $0x78] sm:$0xff] %v486_v36  ;;  %v484_v39 = vadd.f32 0.5, %v468_v37 }
 0x13a   : > { %492 = vst [vmem:[%s1086_s25 + $0x28] sm:$0xff] %v476_v38 }
 0x13b   : > { %500 = vst [vmem:[%s1086_s25 + $0x68] sm:$0xff] %v484_v39 }
 0x13c   : > { %852 = shalt.err (!%p849_p6)
}
 0x13d   : > { %s853_s17 = scalar_lea.hbm %s1106_s3, 2048  ;;  %s857_s24 = scalar_lea.hbm %s1169_s2, 8192 }
 0x13e   : > { %p854_p7 = scmp.ne.s32.totalorder %s1106_s3, %s853_s17  ;;  %p858_p11 = scmp.lt.s32.totalorder %s1106_s3, %s1169_s2 }
 0x13f   : > { %p859_p12 = scmp.lt.s32.totalorder %s857_s24, %s853_s17 }
 0x140   : > { %p855_p9 = pnand %p854_p7, %p1003_p3 }
 0x141   : > { %p860_p13 = por %p859_p12, %p858_p11 }
 0x142   : > { %p856_p10 = pneg %p855_p9 }
 0x144   : > { %p861_p0 = pnand %p860_p13, %p856_p10 }
 0x146   : > { %864 = shalt.err (!%p861_p0)
}
 0x147   : > { %s934_s28 = smov 128   ;;  %s935_s13 = smov 256  }
 0x148   : > { %s936_s29 = smov 8  }
 0x149   : > { %717 = dma.vmem_to_hbm [thread:$0]  (%p1003_p3), %s1109_s12, 2048, %s1106_s3, %s1116_s4, %s934_s28, %s935_s13, %s936_s29  }
 0x14a PF: > { %p723_p1 = scmp.ge.s32.totalorder %s931_s16, 2  ;;  %s534_s30 = sand.u32 1, %s903_s9  }
 0x14b   : > { %s535_s5 = scalar_lea.sflag [#allocation3], %s534_s30 }
 0x14c   : > { %p720_p2 = pnand %p723_p1, %p1012_p8 }
 0x14e   : > { %p721_p4 = pneg %p720_p2 }
 0x150   : > { %898 = dma.done.wait (%p721_p4), %s535_s5, 2048  }
 0x151   : > { %900 = vsyncadd (%p721_p4), %s535_s5, 4294965248  ;;  %s15_s16 = sadd.s32 1, %s931_s16   ;;  %s1172_s9 = smov %s907_s10 }
 0x152   : > { %p12_p5 = scmp.ge.s32.totalorder %s15_s16, 6   ;;  %s1173_s10 = smov %s911_s11 }
 0x153   : > { %s1174_s11 = smov %s1021_s27  ;;  %s1175_s12 = smov %s923_s14 }
 0x154   : > { %s1176_s13 = smov %s927_s15  ;;  %s1177_s14 = smov %s1180_s19 }
 0x155   : > { %s1178_s15 = smov %s1184_s20  ;;  %14 = sbr.rel (!%p12_p5) target bundleno = 5 (0x5), region = 64 }
 0x15a   :  { %540 = vsyncpa [#allocation3], 1 }
 0x15b   :  { %542 = vsyncpa [#allocation3 + $0x1], 1 }

</bundles_post_ra>
